<compile_context>
chip_gen: v7x
topology: tpu7x:2x2x1
jax: 0.10.0
libtpu: 0.0.40
codegen_flags: <defaults>
</compile_context>

<pallas_src>
import functools

import jax
import jax.numpy as jnp
from jax import lax
from jax.experimental import pallas as pl
from jax.experimental.pallas import tpu as pltpu


_VMEM_LIMIT = 32 * 1024 * 1024   # explicit scoped-VMEM budget, safe on v5e/v6e/v7x


def _cparams():
    return pltpu.CompilerParams(
        dimension_semantics=("parallel",),
        vmem_limit_bytes=_VMEM_LIMIT,
    )


def _elu(y):
    return jnp.where(y > 0, y, jnp.expm1(y))   # ELU(alpha=1)


# ---------------------------------------------------------------------------
# pltpu.roll direction probe
# ---------------------------------------------------------------------------
# The conv kernel needs shifted[s] = x[s + delta].  With jnp.roll semantics
# (roll(x, r)[s] == x[(s - r) % L]) the rotate amount is r = -delta.  pltpu.roll
# is documented to match jnp.roll; we verify the hardware rotate direction once
# at runtime so the conv indexing is robust either way.

_ROLL_MATCHES_JNP = None


def _probe_roll_convention():
    def kernel(x_ref, o_ref):
        o_ref[...] = pltpu.roll(x_ref[...], 1, 1)

    x = jnp.arange(8 * 128, dtype=jnp.float32).reshape(8, 128)
    y = pl.pallas_call(kernel, out_shape=jax.ShapeDtypeStruct((8, 128), jnp.float32))(x)
    return bool(jnp.asarray(y)[0, 1] == x[0, 0])


def _ensure_roll_probe():
    global _ROLL_MATCHES_JNP
    if _ROLL_MATCHES_JNP is None:
        _ROLL_MATCHES_JNP = _probe_roll_convention()
    return _ROLL_MATCHES_JNP


def _roll_shift(delta, size, matches_jnp):
    """Static rotate amount r so that pltpu.roll(x, r, axis)[s] == x[(s + delta) % size]."""
    return (-delta) % size if matches_jnp else delta % size


# ---------------------------------------------------------------------------
# Fused Pallas kernels
# ---------------------------------------------------------------------------

def _make_upconv_in_elu_kernel(spatial, compute_dtype):
    """ELU(InstanceNorm(ConvTranspose3d_k2s2(x))) on a NN-upsampled (Cin, S) slab."""
    D2, H2, W2 = spatial
    HW = H2 * W2
    S = D2 * HW
    parities = [(a, b, c) for a in range(2) for b in range(2) for c in range(2)]

    def kernel(xup_ref, w_ref, o_ref):
        cup = o_ref.shape[1]
        x = xup_ref[0]                                       # (Cin, S)
        s_idx = lax.broadcasted_iota(jnp.int32, (1, S), 1)
        pd = (s_idx // HW) % 2                               # parity of output d
        ph = (s_idx // W2) % 2                               # parity of output h (H2 even)
        pw = s_idx % 2                                       # parity of output w (W2 even)

        acc = jnp.zeros((cup, S), jnp.float32)
        for i, (a, b, c) in enumerate(parities):
            mask = (pd == a) & (ph == b) & (pw == c)
            xm = jnp.where(mask, x, 0.0).astype(compute_dtype)
            acc = acc + jnp.dot(w_ref[i].astype(compute_dtype), xm,
                                preferred_element_type=jnp.float32)

        # InstanceNorm over the spatial (lane) axis per (n, c) row, then ELU.
        # (the deconv bias is skipped: it is cancelled by the mean subtraction)
        mean = jnp.mean(acc, axis=-1, keepdims=True)
        var = jnp.mean((acc - mean) * (acc - mean), axis=-1, keepdims=True)
        y = (acc - mean) * lax.rsqrt(var + 1e-5)
        o_ref[0] = _elu(y).astype(o_ref.dtype)

    return kernel


def _make_conv_in_elu_kernel(spatial, ksize, pad, with_residual, roll_matches_jnp,
                             compute_dtype):
    """ELU(InstanceNorm(Conv3d_k,p(x))) [+ residual + ELU] on a (Cin, S) slab."""
    D2, H2, W2 = spatial
    HW = H2 * W2
    S = D2 * HW
    offsets = [(kd, kh, kw) for kd in range(ksize)
               for kh in range(ksize) for kw in range(ksize)]

    def kernel(x_ref, w_ref, *rest):
        if with_residual:
            res_ref, o_ref = rest
        else:
            (o_ref,) = rest
        cout = o_ref.shape[1]
        x = x_ref[0]                                          # (Cin, S)
        s_idx = lax.broadcasted_iota(jnp.int32, (1, S), 1)    # output flat position
        d_idx = s_idx // HW
        h_idx = (s_idx // W2) % H2
        w_idx = s_idx % W2

        acc = jnp.zeros((cout, S), jnp.float32)
        for i, (kd, kh, kw) in enumerate(offsets):
            dd, dh, dw = kd - pad, kh - pad, kw - pad
            delta = dd * HW + dh * W2 + dw
            if delta == 0:
                shifted = x
            else:
                shifted = pltpu.roll(x, _roll_shift(delta, S, roll_matches_jnp), 1)
            # "same"-padding validity mask for this tap (zero outside the volume).
            mask = ((d_idx + dd >= 0) & (d_idx + dd < D2) &
                    (h_idx + dh >= 0) & (h_idx + dh < H2) &
                    (w_idx + dw >= 0) & (w_idx + dw < W2))
            xm = jnp.where(mask, shifted, 0.0).astype(compute_dtype)
            acc = acc + jnp.dot(w_ref[i].astype(compute_dtype), xm,
                                preferred_element_type=jnp.float32)

        # InstanceNorm over lanes per (n, c) row, then ELU (conv bias skipped:
        # cancelled exactly by the mean subtraction).
        mean = jnp.mean(acc, axis=-1, keepdims=True)
        var = jnp.mean((acc - mean) * (acc - mean), axis=-1, keepdims=True)
        y = (acc - mean) * lax.rsqrt(var + 1e-5)
        y = _elu(y)
        if with_residual:
            y = _elu(y + res_ref[0])     # fused residual add + final ELU
        o_ref[0] = y.astype(o_ref.dtype)

    return kernel


def _add_elu_kernel(a_ref, b_ref, o_ref):
    o_ref[0] = _elu(a_ref[0] + b_ref[0])


# ---------------------------------------------------------------------------
# Pallas wrappers (grid over batch, "parallel")
# ---------------------------------------------------------------------------

def upconv_in_elu(xup_ncs, w_par, spatial, *, compute_dtype=jnp.float32):
    """xup_ncs: (N, Cin, S) NN-upsampled input; w_par: (8, Cup, Cin)."""
    N, Cin, S = xup_ncs.shape
    _, Cup, _ = w_par.shape
    kernel = _make_upconv_in_elu_kernel(spatial, compute_dtype)
    return pl.pallas_call(
        kernel,
        out_shape=jax.ShapeDtypeStruct((N, Cup, S), jnp.float32),
        grid=(N,),
        in_specs=[pl.BlockSpec((1, Cin, S), lambda n: (n, 0, 0)),
                  pl.BlockSpec((8, Cup, Cin), lambda n: (0, 0, 0))],
        out_specs=pl.BlockSpec((1, Cup, S), lambda n: (n, 0, 0)),
        compiler_params=_cparams(),
    )(xup_ncs, w_par)


def conv3d_in_elu(x_ncs, w_off, spatial, *, ksize, pad, residual=None,
                  roll_matches_jnp=True, compute_dtype=jnp.float32):
    """x_ncs: (N, Cin, S); w_off: (k^3, Cout, Cin); residual: optional (N, Cout, S)."""
    N, Cin, S = x_ncs.shape
    K3, Cout, _ = w_off.shape
    kernel = _make_conv_in_elu_kernel(spatial, ksize, pad, residual is not None,
                                      roll_matches_jnp, compute_dtype)
    in_specs = [
        pl.BlockSpec((1, Cin, S), lambda n: (n, 0, 0)),
        pl.BlockSpec((K3, Cout, Cin), lambda n: (0, 0, 0)),
    ]
    args = [x_ncs, w_off]
    if residual is not None:
        in_specs.append(pl.BlockSpec((1, Cout, S), lambda n: (n, 0, 0)))
        args.append(residual)
    return pl.pallas_call(
        kernel,
        out_shape=jax.ShapeDtypeStruct((N, Cout, S), jnp.float32),
        grid=(N,),
        in_specs=in_specs,
        out_specs=pl.BlockSpec((1, Cout, S), lambda n: (n, 0, 0)),
        compiler_params=_cparams(),
    )(*args)


def add_elu(a_ncs, b_ncs):
    N, C, S = a_ncs.shape
    spec = pl.BlockSpec((1, C, S), lambda n: (n, 0, 0))
    return pl.pallas_call(
        _add_elu_kernel,
        out_shape=jax.ShapeDtypeStruct((N, C, S), jnp.float32),
        grid=(N,),
        in_specs=[spec, spec],
        out_specs=spec,
        compiler_params=_cparams(),
    )(a_ncs, b_ncs)


# ---------------------------------------------------------------------------
# Parameters (PyTorch-shaped) and forward pass
# ---------------------------------------------------------------------------

def init_params(key, in_chans, out_chans, n_convs, kernel_size):
    """Deterministic synthetic parameters matching the PyTorch module shapes."""
    c_up = out_chans // 2
    keys = jax.random.split(key, 2 + 2 * n_convs)
    params = {
        # ConvTranspose3d weight: (inChans, outChans//2, 2, 2, 2)
        "up_w": 0.1 * jax.random.normal(keys[0], (in_chans, c_up, 2, 2, 2), jnp.float32),
        "up_b": 0.1 * jax.random.normal(keys[1], (c_up,), jnp.float32),
        "convs": [],
    }
    for i in range(n_convs):
        wc = 0.05 * jax.random.normal(
            keys[2 + 2 * i],
            (out_chans, out_chans, kernel_size, kernel_size, kernel_size), jnp.float32)
        bc = 0.05 * jax.random.normal(keys[3 + 2 * i], (out_chans,), jnp.float32)
        params["convs"].append((wc, bc))
    return params


def up_transition_forward(x, skipx, params, *, kernel_size=3, padding=1,
                          compute_dtype=jnp.float32):
    """x: (N, Cin, D, H, W); skipx: (N, Cout//2, 2D, 2H, 2W).  NCDHW like PyTorch."""
    matches = _ensure_roll_probe()          # run the tiny probe outside jit once
    return _up_transition_jit(x, skipx, params,
                              kernel_size=kernel_size, padding=padding,
                              compute_dtype=compute_dtype, roll_matches_jnp=matches)


@functools.partial(jax.jit, static_argnames=("kernel_size", "padding",
                                             "compute_dtype", "roll_matches_jnp"))
def _up_transition_jit(x, skipx, params, *, kernel_size, padding, compute_dtype,
                       roll_matches_jnp):
    N, Cin, D, H, W = x.shape
    up_w = params["up_w"]                                    # (Cin, Cup, 2, 2, 2)
    Cup = up_w.shape[1]
    D2, H2, W2 = 2 * D, 2 * H, 2 * W
    S = D2 * H2 * W2
    spatial = (D2, H2, W2)

    # --- do1(x): identity (eval mode) -----------------------------------------
    # --- ConvTranspose3d(k=2,s=2) + InstanceNorm + ELU, fused ------------------
    # Nearest-neighbour upsample into the (N, C, S) layout; the 2x2x2 taps are
    # applied in-kernel as parity-masked matmuls (no depth-to-space transpose).
    xup = jnp.broadcast_to(x[:, :, :, None, :, None, :, None],
                           (N, Cin, D, 2, H, 2, W, 2)).reshape(N, Cin, S)
    w_up = jnp.transpose(up_w, (2, 3, 4, 1, 0)).reshape(8, Cup, Cin)  # (abc, Cup, Cin)
    out = upconv_in_elu(xup, w_up, spatial, compute_dtype=compute_dtype)   # (N, Cup, S)

    # --- skip dropout: identity (eval); channel concat -------------------------
    xcat = jnp.concatenate([out, skipx.reshape(N, Cup, S)], axis=1)        # (N, C, S)
    C = xcat.shape[1]

    # --- nConvs x LUConv: ELU(InstanceNorm(Conv3d)), conv fused in-kernel ------
    # The residual add + final ELU is fused into the last conv kernel.
    convs = params["convs"]
    if not convs:
        out = add_elu(xcat, xcat)
    else:
        h = xcat
        k3 = kernel_size ** 3
        for i, (wc, bc) in enumerate(convs):
            del bc  # per-channel bias is cancelled exactly by InstanceNorm
            w_off = jnp.transpose(wc, (2, 3, 4, 0, 1)).reshape(k3, C, C)
            res = xcat if i == len(convs) - 1 else None
            h = conv3d_in_elu(h, w_off, spatial, ksize=kernel_size, pad=padding,
                              residual=res, roll_matches_jnp=roll_matches_jnp,
                              compute_dtype=compute_dtype)
        out = h

    return out.reshape(N, C, D2, H2, W2)


# ---------------------------------------------------------------------------
# Pure-JAX (XLA) reference of the PyTorch module, for an in-script check
# ---------------------------------------------------------------------------

def _instance_norm_ref(x):
    mean = jnp.mean(x, axis=(2, 3, 4), keepdims=True)
    var = jnp.mean((x - mean) ** 2, axis=(2, 3, 4), keepdims=True)
    return (x - mean) * lax.rsqrt(var + 1e-5)


def reference_forward(x, skipx, params, *, kernel_size=3, padding=1):
    up_w, up_b = params["up_w"], params["up_b"]
    N, Cin, D, H, W = x.shape
    Cup = up_w.shape[1]
    D2, H2, W2 = 2 * D, 2 * H, 2 * W

    y = jnp.einsum('nidhw,ioabc->nodahbwc', x, up_w).reshape(N, Cup, D2, H2, W2)
    y = y + up_b[None, :, None, None, None]
    out = _elu(_instance_norm_ref(y))

    xcat = jnp.concatenate([out, skipx], axis=1)
    C = xcat.shape[1]
    h = xcat
    k, p = kernel_size, padding
    for (wc, bc) in params["convs"]:
        hp = jnp.pad(h, ((0, 0), (0, 0), (p, p), (p, p), (p, p)))
        z = jnp.zeros((N, C, D2, H2, W2), jnp.float32)
        for kd in range(k):
            for kh in range(k):
                for kw in range(k):
                    z = z + jnp.einsum(
                        'nidhw,oi->nodhw',
                        hp[:, :, kd:kd + D2, kh:kh + H2, kw:kw + W2],
                        wc[:, :, kd, kh, kw])
        z = z + bc[None, :, None, None, None]
        h = _elu(_instance_norm_ref(z))
    return _elu(h + xcat)


# ---------------------------------------------------------------------------
# Main
# ---------------------------------------------------------------------------

if __name__ == "__main__":
    # UpTransition(inChans=4, outChans=8, nConvs=2, non_linearity='elu',
    #              kernel_size=3, padding=1, dropout=False)
    N, IN_CHANS, OUT_CHANS = 2, 4, 8
    N_CONVS, KSIZE, PAD = 2, 3, 1
    D = H = W = 4                                   # low-res input spatial size

    key = jax.random.PRNGKey(0)
    kx, ks, kp = jax.random.split(key, 3)
    x = jax.random.normal(kx, (N, IN_CHANS, D, H, W), jnp.float32)
    skipx = jax.random.normal(ks, (N, OUT_CHANS // 2, 2 * D, 2 * H, 2 * W), jnp.float32)
    params = init_params(kp, IN_CHANS, OUT_CHANS, N_CONVS, KSIZE)

    out = up_transition_forward(x, skipx, params, kernel_size=KSIZE, padding=PAD)
    out = jax.block_until_ready(out)

    assert out.shape == (N, OUT_CHANS, 2 * D, 2 * H, 2 * W), out.shape
    assert bool(jnp.all(jnp.isfinite(out)))

    # Cross-check against an independent pure-JAX implementation of the module.
    # Tolerance is loose enough to absorb MXU default-precision matmul rounding,
    # yet far below the O(1) errors a layout/indexing bug would produce.
    ref = jax.block_until_ready(
        reference_forward(x, skipx, params, kernel_size=KSIZE, padding=PAD))
    max_err = float(jnp.max(jnp.abs(out - ref)))
    assert max_err < 1e-1, f"mismatch vs pure-JAX reference: max abs err {max_err}"

    print("KERNEL_OK")
</pallas_src>

<mosaic_0001>
module attributes {stable_mosaic.version = 11 : i64} {
  func.func @kernel(%arg0: memref<8x128xf32, #tpu.memory_space<vmem>>, %arg1: memref<8x128xf32, #tpu.memory_space<vmem>>) attributes {dimension_semantics = [], scalar_prefetch = 0 : i64, scratch_operands = 0 : i64, tpu.core_type = #tpu.core_type<tc>} {
    %c0 = arith.constant 0 : index
    %c0_0 = arith.constant 0 : index
    %0 = vector.load %arg0[%c0, %c0_0] : memref<8x128xf32, #tpu.memory_space<vmem>>, vector<8x128xf32>
    %c1_i32 = arith.constant 1 : i32
    %1 = tpu.dynamic_rotate %0 by %c1_i32 dim 1 : vector<8x128xf32>, i32 -> vector<8x128xf32>
    %c0_1 = arith.constant 0 : index
    %c0_2 = arith.constant 0 : index
    %2 = vector.load %arg1[%c0_1, %c0_2] : memref<8x128xf32, #tpu.memory_space<vmem>>, vector<8x128xf32>
    tpu.vector_store %arg1[%c0_1, %c0_2], %1 {strides = array<i32>} : memref<8x128xf32, #tpu.memory_space<vmem>>, vector<8x128xf32>,
    return
  }
}

</mosaic_0001>

<bundles_post_ra>
// kernel: tpu_custom_call.1
= control target key start
LH: loop header
LB: loop body
LE: loop exit
PB: predicated region body
PF: predicated region fallthrough
CT: control target
= control target key end

     0   :  { %6 = vsyncpa [#allocation3], 0  ;;  %s128_s0 = inlined_call_operand.hbm [shape: f32[8,128], index: 0, kind: input, shape index: {}]   ;;  %s129_s1 = inlined_call_operand.hbm [shape: f32[8,128], index: 1, kind: output, shape index: {}]  }
   0x1   :  { %7 = vsyncpa [#allocation4], 0  ;;  %s91_s6 = smov [#allocation2]   ;;  %s43_s10 = scalar_lea.hbm %s128_s0, 128 }
   0x2   :  { %s14_s7 = sshll.u32 %s91_s6, 4  ;;  %p44_p0 = scmp.ne.s32.totalorder %s128_s0, %s43_s10  ;;  %s15_s7 = int_to_ptr.vmem [resolvable:$true] %s14_s7 }
   0x3   :  { %p47_p1 = scmp.lt.u32.totalorder %s43_s10, %s128_s0 }
   0x5   :  { %p49_p2 = pnand %p47_p1, %p44_p0 }
   0x7   :  { %52 = shalt.err (!%p49_p2)
}
   0x8   :  { %s53_s15 = scalar_lea.vmem %s15_s7, 128  ;;  %p58_p4 = scmp.lt.s32.totalorder %s15_s7, %s15_s7 }
   0x9   :  { %p54_p3 = scmp.ne.s32.totalorder %s15_s7, %s53_s15  ;;  %p59_p5 = scmp.lt.s32.totalorder %s53_s15, %s53_s15 }
   0xb   :  { %p60_p6 = por %p59_p5, %p58_p4 }
   0xd   :  { %p61_p7 = pnand %p60_p6, %p54_p3 }
   0xf   :  { %64 = shalt.err (!%p61_p7)
}
  0x10   :  { %17 = dma.hbm_to_vmem [thread:$0]  %s128_s0, 128, %s15_s7, [#allocation3]  }
  0x11   :  { %87 = dma.done.wait [#allocation3], 128  }
  0x12   :  { %88 = vsyncadd [#allocation3], 4294967168  ;;  %v21_v0 = vld [vmem:[#allocation2] sm:$0xff]  ;;  %s92_s18 = smov 1   ;;  %s93_s19 = smov [#allocation5]  }
  0x13   :  { %22 = vrot.lane.b32.xlu0 %v21_v0, %s92_s18  ;;  %s31_s20 = sshll.u32 %s93_s19, 4  ;;  %s32_s20 = int_to_ptr.vmem [resolvable:$true] %s31_s20 }
  0x14   :  { %s65_s21 = scalar_lea.vmem %s32_s20, 128  ;;  %p70_p9 = scmp.lt.s32.totalorder %s32_s20, %s32_s20 }
  0x15   :  { %p66_p8 = scmp.ne.s32.totalorder %s32_s20, %s65_s21  ;;  %p71_p10 = scmp.lt.s32.totalorder %s65_s21, %s65_s21 }
  0x17   :  { %p72_p11 = por %p71_p10, %p70_p9 }
  0x19   :  { %p73_p12 = pnand %p72_p11, %p66_p8 }
  0x85   :  { %v23_v1 = vpop.permute.xlu0 %22 }
  0x86   :  { %24 = vst [vmem:[#allocation5] sm:$0xff] %v23_v1 }
  0x87   :  { %76 = shalt.err (!%p73_p12)
}
  0x88   :  { %s77_s0 = scalar_lea.hbm %s129_s1, 128 }
  0x89   :  { %p78_p13 = scmp.ne.s32.totalorder %s129_s1, %s77_s0  ;;  %p81_p0 = scmp.lt.u32.totalorder %s77_s0, %s129_s1 }
  0x8b   :  { %p83_p1 = pnand %p81_p0, %p78_p13 }
  0x8d   :  { %86 = shalt.err (!%p83_p1)
}
  0x8e   :  { %34 = dma.vmem_to_hbm [thread:$0]  %s32_s20, 128, %s129_s1, [#allocation4]  }
  0x8f   :  { %89 = dma.done.wait [#allocation4], 128  }
  0x90   :  { %90 = vsyncadd [#allocation4], 4294967168 }
  0x91   :  { %38 = vsyncpa [#allocation3], 1 }
  0x92   :  { %39 = vsyncpa [#allocation4], 1 }

</bundles_post_ra>
